<compile_context>
chip_gen: v7x
topology: tpu7x:2x2x1
jax: 0.10.0
libtpu: 0.0.40
codegen_flags: <defaults>
</compile_context>

<pallas_src>
import functools

import jax
import jax.numpy as jnp
from jax.experimental import pallas as pl
from jax.experimental.pallas import tpu as pltpu


_OUT_LANES = 128      # result row: [ce_note, ce_instr, ce_pitch, l1, total, 0, ...]
_OUT_SUB = 8          # sublane pad so the output block is a full (8,128) f32 tile
_MAX_ROW_TILE = 2048  # rows per grid step (amortizes per-step overhead)


def _round_up(x, m):
    return ((x + m - 1) // m) * m


def _cdiv(a, b):
    return -(-a // b)


def _num_tensorcores():
    """2-wide 'parallel' core axis only where a device exposes 2 TensorCores."""
    try:
        kind = jax.devices()[0].device_kind.lower()
    except Exception:  # pragma: no cover
        return 1
    if "lite" in kind or "v5e" in kind or "v6" in kind:
        return 1          # v5e / v6e: single TensorCore -> no fake core axis
    if "v7" in kind or "7x" in kind or "v4" in kind or "v5p" in kind or "v5" in kind:
        return 2          # v7x (2 TC / chip) or megacore chips
    return 1


# ----------------------------------------------------------------------------
# Fused kernel
# ----------------------------------------------------------------------------
def _fused_loss_kernel(w_ref, nt_ref, in_ref, pi_ref, tgt_ref, rp_ref, rt_ref,
                       out_ref, acc_ref, *, n_valid, n_inner, tile_n):
    c = pl.program_id(0)            # "parallel" (core) axis
    b = pl.program_id(1)            # "arbitrary" row-block reduction axis

    @pl.when(b == 0)
    def _init():
        acc_ref[...] = jnp.zeros_like(acc_ref)

    # Row-validity mask (padded rows contribute nothing; the mean divides by
    # the GLOBAL N at finalize).
    row0 = (c * n_inner + b) * tile_n
    rows = row0 + jax.lax.broadcasted_iota(jnp.int32, (tile_n, 1), 0)
    valid = rows < n_valid                                       # [TN,1] bool

    def ce_partial(logits_ref, tgt_col):
        # Per-head cross-entropy row terms: logsumexp(row) - row[target].
        x = logits_ref[...].astype(jnp.float32)                  # [TN, C]
        tn, cdim = x.shape
        m = jnp.max(x, axis=-1, keepdims=True)                   # per-head row max
        e = jnp.exp(x - m)                                       # one exp pass
        lse = m + jnp.log(jnp.sum(e, axis=-1, keepdims=True))
        lane = jax.lax.broadcasted_iota(jnp.int32, (tn, cdim), 1)
        tgt = tgt_ref[:, tgt_col:tgt_col + 1]                    # [TN,1] class id
        pick = jnp.sum(jnp.where(lane == tgt, x, 0.0), axis=-1, keepdims=True)
        return jnp.sum(jnp.where(valid, lse - pick, 0.0), axis=0, keepdims=True)

    ce_nt = ce_partial(nt_ref, 0)                                # [1,1]
    ce_in = ce_partial(in_ref, 1)
    ce_pi = ce_partial(pi_ref, 2)

    l1_rows = jnp.sum(jnp.abs(rp_ref[...].astype(jnp.float32)
                              - rt_ref[...].astype(jnp.float32)),
                      axis=-1, keepdims=True)                    # [TN,1]
    l1 = jnp.sum(jnp.where(valid, l1_rows, 0.0), axis=0, keepdims=True)

    lane_o = jax.lax.broadcasted_iota(jnp.int32, (_OUT_SUB, _OUT_LANES), 1)
    acc_ref[...] += (jnp.where(lane_o == 0, ce_nt, 0.0)
                     + jnp.where(lane_o == 1, ce_in, 0.0)
                     + jnp.where(lane_o == 2, ce_pi, 0.0)
                     + jnp.where(lane_o == 3, l1, 0.0))

    @pl.when(b == pl.num_programs(1) - 1)
    def _finalize():
        r = rp_ref.shape[-1]
        inv_n = jnp.float32(1.0 / n_valid)                       # CE mean over N
        inv_nr = jnp.float32(1.0 / (n_valid * r))                # L1 mean over N*R
        inv = jnp.where(lane_o < 3, inv_n,
              jnp.where(lane_o == 3, inv_nr, 0.0))
        means = acc_ref[...] * inv                               # (8,128)
        # weighted total from SMEM (scalar-prefetch) loss weights
        wvec = (jnp.where(lane_o == 0, w_ref[0], 0.0)
                + jnp.where(lane_o == 1, w_ref[1], 0.0)
                + jnp.where(lane_o == 2, w_ref[2], 0.0)
                + jnp.where(lane_o == 3, w_ref[3], 0.0))
        total = jnp.sum(wvec * means, axis=-1, keepdims=True)    # (8,1)
        out_ref[0] = means + jnp.where(lane_o == 4, total, 0.0)


# ----------------------------------------------------------------------------
# Wrapper: row-pads, merges targets, launches one pallas_call
# ----------------------------------------------------------------------------
def _fused_losses(nt_logits, nt_tgt, in_logits, in_tgt, pi_logits, pi_tgt,
                  reg_pred, reg_tgt, weights):
    n = nt_logits.shape[0]
    reg_pred = reg_pred.reshape(n, -1)
    reg_tgt = reg_tgt.reshape(n, -1)
    r = reg_pred.shape[-1]
    c_nt = nt_logits.shape[-1]
    c_in = in_logits.shape[-1]
    c_pi = pi_logits.shape[-1]

    # Grid / tile sizing: n_inner first, then tile_n (minimizes padded rows).
    ncores = max(1, min(_num_tensorcores(), _cdiv(n, 8)))
    per_core = _cdiv(n, ncores)
    n_inner = max(1, _cdiv(per_core, _MAX_ROW_TILE))
    tile_n = _round_up(_cdiv(per_core, n_inner), 8)
    n_pad = ncores * n_inner * tile_n

    def pad_rows(x):
        return jnp.pad(x, ((0, n_pad - n), (0, 0)))

    # Logits stay unpacked & lane-unpadded (block last dim = full array dim);
    # dtype is kept as-is (e.g. bf16) — the kernel upcasts in VMEM.
    nt_p = pad_rows(nt_logits)
    in_p = pad_rows(in_logits)
    pi_p = pad_rows(pi_logits)

    # Three class-target vectors merged into one (N,3) int32 array -> one DMA.
    tgt = jnp.stack([nt_tgt.reshape(n).astype(jnp.int32),
                     in_tgt.reshape(n).astype(jnp.int32),
                     pi_tgt.reshape(n).astype(jnp.int32)], axis=-1)
    tgt_p = pad_rows(tgt)
    rp_p = pad_rows(reg_pred)
    rt_p = pad_rows(reg_tgt)

    kernel = functools.partial(_fused_loss_kernel,
                               n_valid=n, n_inner=n_inner, tile_n=tile_n)

    row_map = lambda c, b, w: (c * n_inner + b, 0)

    def _nbytes(x):
        return x.size * jnp.dtype(x.dtype).itemsize

    cost = pl.CostEstimate(
        flops=int(n_pad * (6 * (c_nt + c_in + c_pi) + 4 * r) + 10 * _OUT_LANES),
        transcendentals=int(n_pad * (c_nt + c_in + c_pi + 3)),
        bytes_accessed=int(sum(_nbytes(a) for a in
                               (nt_p, in_p, pi_p, tgt_p, rp_p, rt_p))
                           + ncores * _OUT_SUB * _OUT_LANES * 4))

    out = pl.pallas_call(
        kernel,
        out_shape=jax.ShapeDtypeStruct((ncores, _OUT_SUB, _OUT_LANES),
                                       jnp.float32),
        grid_spec=pltpu.PrefetchScalarGridSpec(
            num_scalar_prefetch=1,                      # loss weights -> SMEM
            grid=(ncores, n_inner),
            in_specs=[
                pl.BlockSpec((tile_n, c_nt), row_map),  # note_type logits
                pl.BlockSpec((tile_n, c_in), row_map),  # instrument logits
                pl.BlockSpec((tile_n, c_pi), row_map),  # pitch logits
                pl.BlockSpec((tile_n, 3), row_map),     # packed class targets
                pl.BlockSpec((tile_n, r), row_map),     # regression pred
                pl.BlockSpec((tile_n, r), row_map),     # regression target
            ],
            out_specs=pl.BlockSpec((1, _OUT_SUB, _OUT_LANES),
                                   lambda c, b, w: (c, 0, 0)),
            scratch_shapes=[pltpu.VMEM((_OUT_SUB, _OUT_LANES), jnp.float32)],
        ),
        compiler_params=pltpu.CompilerParams(
            dimension_semantics=("parallel", "arbitrary")),
        cost_estimate=cost,
    )(weights, nt_p, in_p, pi_p, tgt_p, rp_p, rt_p)

    # combine per-core partial rows (each core already divided by the global N)
    return jnp.sum(out[:, 0, :], axis=0)                # (128,)


@jax.jit
def _criterion_forward(nt_logits, nt_tgt, in_logits, in_tgt, pi_logits, pi_tgt,
                       reg_pred, reg_tgt, weights):
    vec = _fused_losses(nt_logits, nt_tgt, in_logits, in_tgt, pi_logits, pi_tgt,
                        reg_pred, reg_tgt, weights)
    losses = {
        "note_type": vec[0],
        "instrument": vec[1],
        "pitch": vec[2],
        "regression": vec[3],
        "total": vec[4],
    }
    weighted = {
        "note_type": weights[0] * vec[0],
        "instrument": weights[1] * vec[1],
        "pitch": weights[2] * vec[2],
        "regression": weights[3] * vec[3],
    }
    return losses, weighted


# ----------------------------------------------------------------------------
# CustomCriterion equivalent
# ----------------------------------------------------------------------------
class CustomCriterion:
    def __init__(self, config):
        self.loss_weights = {
            "note_type": config.get("cost_note_type", 1),
            "instrument": config.get("cost_instrument", 1),
            "pitch": config.get("cost_pitch", 1),
            "regression": config.get("cost_regression", 1),
        }
        self.num_note_types = config["num_classes"]["note_type"]
        self.num_instruments = config["num_classes"]["instrument"]
        self.num_pitches = config["num_classes"]["pitch"]
        self._weights = jnp.asarray(
            [self.loss_weights["note_type"], self.loss_weights["instrument"],
             self.loss_weights["pitch"], self.loss_weights["regression"]],
            jnp.float32)

    def __call__(self, outputs, targets):
        losses, weighted = _criterion_forward(
            outputs["note_type"], targets["note_type"],
            outputs["instrument"], targets["instrument"],
            outputs["pitch"], targets["pitch"],
            outputs["regression"], targets["regression"],
            self._weights)
        debuginfo = {
            "loss_weights": self.loss_weights,
            "per_head_weighted": weighted,
        }
        return losses, debuginfo


# ----------------------------------------------------------------------------
# Pure-JAX reference for correctness sanity check
# ----------------------------------------------------------------------------
def _ce_ref(logits, targets):
    logits = logits.astype(jnp.float32)
    lse = jax.nn.logsumexp(logits, axis=-1)
    picked = jnp.take_along_axis(
        logits, targets[:, None].astype(jnp.int32), axis=-1)[:, 0]
    return jnp.mean(lse - picked)


def _l1_ref(pred, target):
    return jnp.mean(jnp.abs(pred.astype(jnp.float32) - target.astype(jnp.float32)))


# ----------------------------------------------------------------------------
if __name__ == "__main__":
    def run_case(config, n, r, seed):
        key = jax.random.PRNGKey(seed)
        k = jax.random.split(key, 8)
        nc = config["num_classes"]
        outputs = {
            "note_type": jax.random.normal(k[0], (n, nc["note_type"]), jnp.float32),
            "instrument": jax.random.normal(k[1], (n, nc["instrument"]), jnp.float32),
            "pitch": jax.random.normal(k[2], (n, nc["pitch"]), jnp.float32),
            "regression": jax.random.normal(k[3], (n, r), jnp.float32),
        }
        targets = {
            "note_type": jax.random.randint(k[4], (n,), 0, nc["note_type"], jnp.int32),
            "instrument": jax.random.randint(k[5], (n,), 0, nc["instrument"], jnp.int32),
            "pitch": jax.random.randint(k[6], (n,), 0, nc["pitch"], jnp.int32),
            "regression": jax.random.normal(k[7], (n, r), jnp.float32),
        }

        criterion = CustomCriterion(config)
        losses, debuginfo = criterion(outputs, targets)
        jax.block_until_ready(losses["total"])

        ref = {
            "note_type": _ce_ref(outputs["note_type"], targets["note_type"]),
            "instrument": _ce_ref(outputs["instrument"], targets["instrument"]),
            "pitch": _ce_ref(outputs["pitch"], targets["pitch"]),
            "regression": _l1_ref(outputs["regression"], targets["regression"]),
        }
        w = criterion.loss_weights
        ref["total"] = (w["note_type"] * ref["note_type"]
                        + w["instrument"] * ref["instrument"]
                        + w["pitch"] * ref["pitch"]
                        + w["regression"] * ref["regression"])
        for name in ("note_type", "instrument", "pitch", "regression", "total"):
            assert jnp.allclose(losses[name], ref[name], rtol=1e-5, atol=1e-5), (
                name, losses[name], ref[name])

    # Small deterministic case (batch of predicted notes, onset/duration regression).
    run_case({"cost_note_type": 1.0, "cost_instrument": 1.0, "cost_pitch": 1.0,
              "cost_regression": 1.0,
              "num_classes": {"note_type": 4, "instrument": 8, "pitch": 16}},
             n=8, r=2, seed=0)

    # Non-aligned batch + non-uniform weights exercises row masking and weighting.
    run_case({"cost_note_type": 2.0, "cost_instrument": 0.5, "cost_pitch": 1.5,
              "cost_regression": 3.0,
              "num_classes": {"note_type": 3, "instrument": 5, "pitch": 20}},
             n=37, r=3, seed=1)

    print("KERNEL_OK")
</pallas_src>

<mosaic_0001>
module attributes {stable_mosaic.version = 11 : i64} {
  func.func @_fused_loss_kernel(%arg0: i32, %arg1: i32, %arg2: memref<4xf32, #tpu.memory_space<smem>>, %arg3: memref<8x4xf32, #tpu.memory_space<vmem>>, %arg4: memref<8x8xf32, #tpu.memory_space<vmem>>, %arg5: memref<8x16xf32, #tpu.memory_space<vmem>>, %arg6: memref<8x3xi32, #tpu.memory_space<vmem>>, %arg7: memref<8x2xf32, #tpu.memory_space<vmem>>, %arg8: memref<8x2xf32, #tpu.memory_space<vmem>>, %arg9: memref<1x8x128xf32, #tpu.memory_space<vmem>>, %arg10: memref<8x128xf32, #tpu.memory_space<vmem>>) attributes {dimension_semantics = [#tpu.dimension_semantics<parallel>, #tpu.dimension_semantics<arbitrary>], iteration_bounds = array<i64: 1, 1>, scalar_prefetch = 1 : i64, scratch_operands = 1 : i64, tpu.core_type = #tpu.core_type<tc>, window_params = [{transform_indices = @transform_0, window_bounds = array<i64: 8, 4>}, {transform_indices = @transform_1, window_bounds = array<i64: 8, 8>}, {transform_indices = @transform_2, window_bounds = array<i64: 8, 16>}, {transform_indices = @transform_3, window_bounds = array<i64: 8, 3>}, {transform_indices = @transform_4, window_bounds = array<i64: 8, 2>}, {transform_indices = @transform_5, window_bounds = array<i64: 8, 2>}, {transform_indices = @transform_6, window_bounds = array<i64: 1, 8, 128>}]} {
    %c0_i32 = arith.constant 0 : i32
    %0 = arith.cmpi eq, %arg1, %c0_i32 : i32
    %1 = arith.extui %0 : i1 to i32
    %c0_i32_0 = arith.constant 0 : i32
    %2 = arith.cmpi ne, %1, %c0_i32_0 : i32
    scf.if %2 {
      %cst_47 = arith.constant 0.000000e+00 : f32
      %124 = vector.broadcast %cst_47 : f32 to vector<8x128xf32>
      %c0_48 = arith.constant 0 : index
      %c0_49 = arith.constant 0 : index
      %125 = vector.load %arg10[%c0_48, %c0_49] : memref<8x128xf32, #tpu.memory_space<vmem>>, vector<8x128xf32>
      tpu.vector_store %arg10[%c0_48, %c0_49], %124 {strides = array<i32>} : memref<8x128xf32, #tpu.memory_space<vmem>>, vector<8x128xf32>,
    } else {
    }
    %c1_i32 = arith.constant 1 : i32
    %3 = arith.muli %arg0, %c1_i32 : i32
    %4 = arith.addi %3, %arg1 : i32
    %c8_i32 = arith.constant 8 : i32
    %5 = arith.muli %4, %c8_i32 : i32
    %6 = tpu.iota {dimensions = array<i32: 0>} : vector<8x1xi32>
    %7 = vector.broadcast %5 : i32 to vector<8x1xi32>
    %8 = arith.addi %7, %6 : vector<8x1xi32>
    %c8_i32_1 = arith.constant 8 : i32
    %9 = vector.broadcast %c8_i32_1 : i32 to vector<8x1xi32>
    %10 = arith.cmpi slt, %8, %9 : vector<8x1xi32>
    %c0 = arith.constant 0 : index
    %c0_2 = arith.constant 0 : index
    %11 = vector.load %arg3[%c0, %c0_2] : memref<8x4xf32, #tpu.memory_space<vmem>>, vector<8x4xf32>
    %cst = arith.constant dense<0xFF800000> : vector<8xf32>
    %12 = vector.multi_reduction <maximumf>, %11, %cst [1] : vector<8x4xf32> to vector<8xf32>
    %13 = vector.shape_cast %12 : vector<8xf32> to vector<8x1xf32>
    %14 = vector.broadcast %13 : vector<8x1xf32> to vector<8x4xf32>
    %15 = arith.subf %11, %14 : vector<8x4xf32>
    %16 = math.exp %15 : vector<8x4xf32>
    %cst_3 = arith.constant dense<0.000000e+00> : vector<8xf32>
    %17 = vector.multi_reduction <add>, %16, %cst_3 [1] : vector<8x4xf32> to vector<8xf32>
    %18 = vector.shape_cast %17 : vector<8xf32> to vector<8x1xf32>
    %19 = math.log %18 : vector<8x1xf32>
    %20 = arith.addf %13, %19 : vector<8x1xf32>
    %21 = tpu.iota {dimensions = array<i32: 1>} : vector<8x4xi32>
    %c0_4 = arith.constant 0 : index
    %c0_5 = arith.constant 0 : index
    %22 = vector.load %arg6[%c0_4, %c0_5] : memref<8x3xi32, #tpu.memory_space<vmem>>, vector<8x1xi32>
    %23 = vector.broadcast %22 : vector<8x1xi32> to vector<8x4xi32>
    %24 = arith.cmpi eq, %21, %23 : vector<8x4xi32>
    %cst_6 = arith.constant 0.000000e+00 : f32
    %25 = vector.broadcast %cst_6 : f32 to vector<8x4xf32>
    %26 = arith.select %24, %11, %25 : vector<8x4xi1>, vector<8x4xf32>
    %cst_7 = arith.constant dense<0.000000e+00> : vector<8xf32>
    %27 = vector.multi_reduction <add>, %26, %cst_7 [1] : vector<8x4xf32> to vector<8xf32>
    %28 = vector.shape_cast %27 : vector<8xf32> to vector<8x1xf32>
    %29 = arith.subf %20, %28 : vector<8x1xf32>
    %cst_8 = arith.constant 0.000000e+00 : f32
    %30 = vector.broadcast %cst_8 : f32 to vector<8x1xf32>
    %31 = arith.select %10, %29, %30 : vector<8x1xi1>, vector<8x1xf32>
    %cst_9 = arith.constant dense<0.000000e+00> : vector<1xf32>
    %32 = vector.multi_reduction <add>, %31, %cst_9 [0] : vector<8x1xf32> to vector<1xf32>
    %33 = vector.shape_cast %32 : vector<1xf32> to vector<1x1xf32>
    %c0_10 = arith.constant 0 : index
    %c0_11 = arith.constant 0 : index
    %34 = vector.load %arg4[%c0_10, %c0_11] : memref<8x8xf32, #tpu.memory_space<vmem>>, vector<8x8xf32>
    %cst_12 = arith.constant dense<0xFF800000> : vector<8xf32>
    %35 = vector.multi_reduction <maximumf>, %34, %cst_12 [1] : vector<8x8xf32> to vector<8xf32>
    %36 = vector.shape_cast %35 : vector<8xf32> to vector<8x1xf32>
    %37 = vector.broadcast %36 : vector<8x1xf32> to vector<8x8xf32>
    %38 = arith.subf %34, %37 : vector<8x8xf32>
    %39 = math.exp %38 : vector<8x8xf32>
    %cst_13 = arith.constant dense<0.000000e+00> : vector<8xf32>
    %40 = vector.multi_reduction <add>, %39, %cst_13 [1] : vector<8x8xf32> to vector<8xf32>
    %41 = vector.shape_cast %40 : vector<8xf32> to vector<8x1xf32>
    %42 = math.log %41 : vector<8x1xf32>
    %43 = arith.addf %36, %42 : vector<8x1xf32>
    %44 = tpu.iota {dimensions = array<i32: 1>} : vector<8x8xi32>
    %c0_14 = arith.constant 0 : index
    %c1 = arith.constant 1 : index
    %45 = vector.load %arg6[%c0_14, %c1] : memref<8x3xi32, #tpu.memory_space<vmem>>, vector<8x1xi32>
    %46 = vector.broadcast %45 : vector<8x1xi32> to vector<8x8xi32>
    %47 = arith.cmpi eq, %44, %46 : vector<8x8xi32>
    %cst_15 = arith.constant 0.000000e+00 : f32
    %48 = vector.broadcast %cst_15 : f32 to vector<8x8xf32>
    %49 = arith.select %47, %34, %48 : vector<8x8xi1>, vector<8x8xf32>
    %cst_16 = arith.constant dense<0.000000e+00> : vector<8xf32>
    %50 = vector.multi_reduction <add>, %49, %cst_16 [1] : vector<8x8xf32> to vector<8xf32>
    %51 = vector.shape_cast %50 : vector<8xf32> to vector<8x1xf32>
    %52 = arith.subf %43, %51 : vector<8x1xf32>
    %cst_17 = arith.constant 0.000000e+00 : f32
    %53 = vector.broadcast %cst_17 : f32 to vector<8x1xf32>
    %54 = arith.select %10, %52, %53 : vector<8x1xi1>, vector<8x1xf32>
    %cst_18 = arith.constant dense<0.000000e+00> : vector<1xf32>
    %55 = vector.multi_reduction <add>, %54, %cst_18 [0] : vector<8x1xf32> to vector<1xf32>
    %56 = vector.shape_cast %55 : vector<1xf32> to vector<1x1xf32>
    %c0_19 = arith.constant 0 : index
    %c0_20 = arith.constant 0 : index
    %57 = vector.load %arg5[%c0_19, %c0_20] : memref<8x16xf32, #tpu.memory_space<vmem>>, vector<8x16xf32>
    %cst_21 = arith.constant dense<0xFF800000> : vector<8xf32>
    %58 = vector.multi_reduction <maximumf>, %57, %cst_21 [1] : vector<8x16xf32> to vector<8xf32>
    %59 = vector.shape_cast %58 : vector<8xf32> to vector<8x1xf32>
    %60 = vector.broadcast %59 : vector<8x1xf32> to vector<8x16xf32>
    %61 = arith.subf %57, %60 : vector<8x16xf32>
    %62 = math.exp %61 : vector<8x16xf32>
    %cst_22 = arith.constant dense<0.000000e+00> : vector<8xf32>
    %63 = vector.multi_reduction <add>, %62, %cst_22 [1] : vector<8x16xf32> to vector<8xf32>
    %64 = vector.shape_cast %63 : vector<8xf32> to vector<8x1xf32>
    %65 = math.log %64 : vector<8x1xf32>
    %66 = arith.addf %59, %65 : vector<8x1xf32>
    %67 = tpu.iota {dimensions = array<i32: 1>} : vector<8x16xi32>
    %c0_23 = arith.constant 0 : index
    %c2 = arith.constant 2 : index
    %68 = vector.load %arg6[%c0_23, %c2] : memref<8x3xi32, #tpu.memory_space<vmem>>, vector<8x1xi32>
    %69 = vector.broadcast %68 : vector<8x1xi32> to vector<8x16xi32>
    %70 = arith.cmpi eq, %67, %69 : vector<8x16xi32>
    %cst_24 = arith.constant 0.000000e+00 : f32
    %71 = vector.broadcast %cst_24 : f32 to vector<8x16xf32>
    %72 = arith.select %70, %57, %71 : vector<8x16xi1>, vector<8x16xf32>
    %cst_25 = arith.constant dense<0.000000e+00> : vector<8xf32>
    %73 = vector.multi_reduction <add>, %72, %cst_25 [1] : vector<8x16xf32> to vector<8xf32>
    %74 = vector.shape_cast %73 : vector<8xf32> to vector<8x1xf32>
    %75 = arith.subf %66, %74 : vector<8x1xf32>
    %cst_26 = arith.constant 0.000000e+00 : f32
    %76 = vector.broadcast %cst_26 : f32 to vector<8x1xf32>
    %77 = arith.select %10, %75, %76 : vector<8x1xi1>, vector<8x1xf32>
    %cst_27 = arith.constant dense<0.000000e+00> : vector<1xf32>
    %78 = vector.multi_reduction <add>, %77, %cst_27 [0] : vector<8x1xf32> to vector<1xf32>
    %79 = vector.shape_cast %78 : vector<1xf32> to vector<1x1xf32>
    %c0_28 = arith.constant 0 : index
    %c0_29 = arith.constant 0 : index
    %80 = vector.load %arg7[%c0_28, %c0_29] : memref<8x2xf32, #tpu.memory_space<vmem>>, vector<8x2xf32>
    %c0_30 = arith.constant 0 : index
    %c0_31 = arith.constant 0 : index
    %81 = vector.load %arg8[%c0_30, %c0_31] : memref<8x2xf32, #tpu.memory_space<vmem>>, vector<8x2xf32>
    %82 = arith.subf %80, %81 : vector<8x2xf32>
    %83 = math.absf %82 : vector<8x2xf32>
    %cst_32 = arith.constant dense<0.000000e+00> : vector<8xf32>
    %84 = vector.multi_reduction <add>, %83, %cst_32 [1] : vector<8x2xf32> to vector<8xf32>
    %85 = vector.shape_cast %84 : vector<8xf32> to vector<8x1xf32>
    %cst_33 = arith.constant 0.000000e+00 : f32
    %86 = vector.broadcast %cst_33 : f32 to vector<8x1xf32>
    %87 = arith.select %10, %85, %86 : vector<8x1xi1>, vector<8x1xf32>
    %cst_34 = arith.constant dense<0.000000e+00> : vector<1xf32>
    %88 = vector.multi_reduction <add>, %87, %cst_34 [0] : vector<8x1xf32> to vector<1xf32>
    %89 = vector.shape_cast %88 : vector<1xf32> to vector<1x1xf32>
    %90 = tpu.iota {dimensions = array<i32: 1>} : vector<8x128xi32>
    %c0_35 = arith.constant 0 : index
    %c0_36 = arith.constant 0 : index
    %91 = vector.load %arg10[%c0_35, %c0_36] : memref<8x128xf32, #tpu.memory_space<vmem>>, vector<8x128xf32>
    %c0_i32_37 = arith.constant 0 : i32
    %92 = vector.broadcast %c0_i32_37 : i32 to vector<8x128xi32>
    %93 = arith.cmpi eq, %90, %92 : vector<8x128xi32>
    %cst_38 = arith.constant 0.000000e+00 : f32
    %94 = vector.shape_cast %33 : vector<1x1xf32> to vector<1x1xf32>
    %95 = vector.broadcast %94 : vector<1x1xf32> to vector<8x128xf32>
    %96 = vector.broadcast %cst_38 : f32 to vector<8x128xf32>
    %97 = arith.select %93, %95, %96 : vector<8x128xi1>, vector<8x128xf32>
    %c1_i32_39 = arith.constant 1 : i32
    %98 = vector.broadcast %c1_i32_39 : i32 to vector<8x128xi32>
    %99 = arith.cmpi eq, %90, %98 : vector<8x128xi32>
    %cst_40 = arith.constant 0.000000e+00 : f32
    %100 = vector.shape_cast %56 : vector<1x1xf32> to vector<1x1xf32>
    %101 = vector.broadcast %100 : vector<1x1xf32> to vector<8x128xf32>
    %102 = vector.broadcast %cst_40 : f32 to vector<8x128xf32>
    %103 = arith.select %99, %101, %102 : vector<8x128xi1>, vector<8x128xf32>
    %104 = arith.addf %97, %103 : vector<8x128xf32>
    %c2_i32 = arith.constant 2 : i32
    %105 = vector.broadcast %c2_i32 : i32 to vector<8x128xi32>
    %106 = arith.cmpi eq, %90, %105 : vector<8x128xi32>
    %cst_41 = arith.constant 0.000000e+00 : f32
    %107 = vector.shape_cast %79 : vector<1x1xf32> to vector<1x1xf32>
    %108 = vector.broadcast %107 : vector<1x1xf32> to vector<8x128xf32>
    %109 = vector.broadcast %cst_41 : f32 to vector<8x128xf32>
    %110 = arith.select %106, %108, %109 : vector<8x128xi1>, vector<8x128xf32>
    %111 = arith.addf %104, %110 : vector<8x128xf32>
    %c3_i32 = arith.constant 3 : i32
    %112 = vector.broadcast %c3_i32 : i32 to vector<8x128xi32>
    %113 = arith.cmpi eq, %90, %112 : vector<8x128xi32>
    %cst_42 = arith.constant 0.000000e+00 : f32
    %114 = vector.shape_cast %89 : vector<1x1xf32> to vector<1x1xf32>
    %115 = vector.broadcast %114 : vector<1x1xf32> to vector<8x128xf32>
    %116 = vector.broadcast %cst_42 : f32 to vector<8x128xf32>
    %117 = arith.select %113, %115, %116 : vector<8x128xi1>, vector<8x128xf32>
    %118 = arith.addf %111, %117 : vector<8x128xf32>
    %119 = arith.addf %91, %118 : vector<8x128xf32>
    %c0_43 = arith.constant 0 : index
    %c0_44 = arith.constant 0 : index
    %120 = vector.load %arg10[%c0_43, %c0_44] : memref<8x128xf32, #tpu.memory_space<vmem>>, vector<8x128xf32>
    tpu.vector_store %arg10[%c0_43, %c0_44], %119 {strides = array<i32>} : memref<8x128xf32, #tpu.memory_space<vmem>>, vector<8x128xf32>,
    %c0_i32_45 = arith.constant 0 : i32
    %121 = arith.cmpi eq, %arg1, %c0_i32_45 : i32
    %122 = arith.extui %121 : i1 to i32
    %c0_i32_46 = arith.constant 0 : i32
    %123 = arith.cmpi ne, %122, %c0_i32_46 : i32
    scf.if %123 {
      %c3_i32_47 = arith.constant 3 : i32
      %124 = vector.broadcast %c3_i32_47 : i32 to vector<8x128xi32>
      %125 = arith.cmpi slt, %90, %124 : vector<8x128xi32>
      %c3_i32_48 = arith.constant 3 : i32
      %126 = vector.broadcast %c3_i32_48 : i32 to vector<8x128xi32>
      %127 = arith.cmpi eq, %90, %126 : vector<8x128xi32>
      %cst_49 = arith.constant 6.250000e-02 : f32
      %cst_50 = arith.constant 0.000000e+00 : f32
      %128 = vector.broadcast %cst_49 : f32 to vector<8x128xf32>
      %129 = vector.broadcast %cst_50 : f32 to vector<8x128xf32>
      %130 = arith.select %127, %128, %129 : vector<8x128xi1>, vector<8x128xf32>
      %cst_51 = arith.constant 1.250000e-01 : f32
      %131 = vector.broadcast %cst_51 : f32 to vector<8x128xf32>
      %132 = arith.select %125, %131, %130 : vector<8x128xi1>, vector<8x128xf32>
      %c0_52 = arith.constant 0 : index
      %c0_53 = arith.constant 0 : index
      %133 = vector.load %arg10[%c0_52, %c0_53] : memref<8x128xf32, #tpu.memory_space<vmem>>, vector<8x128xf32>
      %134 = arith.mulf %133, %132 : vector<8x128xf32>
      %c0_i32_54 = arith.constant 0 : i32
      %135 = vector.broadcast %c0_i32_54 : i32 to vector<8x128xi32>
      %136 = arith.cmpi eq, %90, %135 : vector<8x128xi32>
      %c0_55 = arith.constant 0 : index
      %137 = memref.load %arg2[%c0_55] : memref<4xf32, #tpu.memory_space<smem>>
      %cst_56 = arith.constant 0.000000e+00 : f32
      %138 = vector.broadcast %137 : f32 to vector<8x128xf32>
      %139 = vector.broadcast %cst_56 : f32 to vector<8x128xf32>
      %140 = arith.select %136, %138, %139 : vector<8x128xi1>, vector<8x128xf32>
      %c1_i32_57 = arith.constant 1 : i32
      %141 = vector.broadcast %c1_i32_57 : i32 to vector<8x128xi32>
      %142 = arith.cmpi eq, %90, %141 : vector<8x128xi32>
      %c1_58 = arith.constant 1 : index
      %143 = memref.load %arg2[%c1_58] : memref<4xf32, #tpu.memory_space<smem>>
      %cst_59 = arith.constant 0.000000e+00 : f32
      %144 = vector.broadcast %143 : f32 to vector<8x128xf32>
      %145 = vector.broadcast %cst_59 : f32 to vector<8x128xf32>
      %146 = arith.select %142, %144, %145 : vector<8x128xi1>, vector<8x128xf32>
      %147 = arith.addf %140, %146 : vector<8x128xf32>
      %c2_i32_60 = arith.constant 2 : i32
      %148 = vector.broadcast %c2_i32_60 : i32 to vector<8x128xi32>
      %149 = arith.cmpi eq, %90, %148 : vector<8x128xi32>
      %c2_61 = arith.constant 2 : index
      %150 = memref.load %arg2[%c2_61] : memref<4xf32, #tpu.memory_space<smem>>
      %cst_62 = arith.constant 0.000000e+00 : f32
      %151 = vector.broadcast %150 : f32 to vector<8x128xf32>
      %152 = vector.broadcast %cst_62 : f32 to vector<8x128xf32>
      %153 = arith.select %149, %151, %152 : vector<8x128xi1>, vector<8x128xf32>
      %154 = arith.addf %147, %153 : vector<8x128xf32>
      %c3_i32_63 = arith.constant 3 : i32
      %155 = vector.broadcast %c3_i32_63 : i32 to vector<8x128xi32>
      %156 = arith.cmpi eq, %90, %155 : vector<8x128xi32>
      %c3 = arith.constant 3 : index
      %157 = memref.load %arg2[%c3] : memref<4xf32, #tpu.memory_space<smem>>
      %cst_64 = arith.constant 0.000000e+00 : f32
      %158 = vector.broadcast %157 : f32 to vector<8x128xf32>
      %159 = vector.broadcast %cst_64 : f32 to vector<8x128xf32>
      %160 = arith.select %156, %158, %159 : vector<8x128xi1>, vector<8x128xf32>
      %161 = arith.addf %154, %160 : vector<8x128xf32>
      %162 = arith.mulf %161, %134 : vector<8x128xf32>
      %cst_65 = arith.constant dense<0.000000e+00> : vector<8xf32>
      %163 = vector.multi_reduction <add>, %162, %cst_65 [1] : vector<8x128xf32> to vector<8xf32>
      %164 = vector.shape_cast %163 : vector<8xf32> to vector<8x1xf32>
      %c4_i32 = arith.constant 4 : i32
      %165 = vector.broadcast %c4_i32 : i32 to vector<8x128xi32>
      %166 = arith.cmpi eq, %90, %165 : vector<8x128xi32>
      %cst_66 = arith.constant 0.000000e+00 : f32
      %167 = vector.shape_cast %164 : vector<8x1xf32> to vector<8x1xf32>
      %168 = vector.broadcast %167 : vector<8x1xf32> to vector<8x128xf32>
      %169 = vector.broadcast %cst_66 : f32 to vector<8x128xf32>
      %170 = arith.select %166, %168, %169 : vector<8x128xi1>, vector<8x128xf32>
      %171 = arith.addf %134, %170 : vector<8x128xf32>
      %c0_67 = arith.constant 0 : index
      %c0_68 = arith.constant 0 : index
      %c0_69 = arith.constant 0 : index
      %172 = vector.load %arg9[%c0_67, %c0_68, %c0_69] : memref<1x8x128xf32, #tpu.memory_space<vmem>>, vector<1x8x128xf32>
      %173 = vector.shape_cast %172 : vector<1x8x128xf32> to vector<8x128xf32>
      %174 = vector.shape_cast %171 : vector<8x128xf32> to vector<1x8x128xf32>
      tpu.vector_store %arg9[%c0_67, %c0_68, %c0_69], %174 {strides = array<i32>} : memref<1x8x128xf32, #tpu.memory_space<vmem>>, vector<1x8x128xf32>,
    } else {
    }
    return
  }
  func.func @transform_0(%arg0: i32, %arg1: i32, %arg2: memref<4xf32, #tpu.memory_space<smem>>) -> (i32, i32) {
    %c1_i32 = arith.constant 1 : i32
    %0 = arith.muli %arg0, %c1_i32 : i32
    %1 = arith.addi %0, %arg1 : i32
    %c0_i32 = arith.constant 0 : i32
    %c0_i32_0 = arith.constant 0 : i32
    return %1, %c0_i32 : i32, i32
  }
  func.func @transform_1(%arg0: i32, %arg1: i32, %arg2: memref<4xf32, #tpu.memory_space<smem>>) -> (i32, i32) {
    %c1_i32 = arith.constant 1 : i32
    %0 = arith.muli %arg0, %c1_i32 : i32
    %1 = arith.addi %0, %arg1 : i32
    %c0_i32 = arith.constant 0 : i32
    %c0_i32_0 = arith.constant 0 : i32
    return %1, %c0_i32 : i32, i32
  }
  func.func @transform_2(%arg0: i32, %arg1: i32, %arg2: memref<4xf32, #tpu.memory_space<smem>>) -> (i32, i32) {
    %c1_i32 = arith.constant 1 : i32
    %0 = arith.muli %arg0, %c1_i32 : i32
    %1 = arith.addi %0, %arg1 : i32
    %c0_i32 = arith.constant 0 : i32
    %c0_i32_0 = arith.constant 0 : i32
    return %1, %c0_i32 : i32, i32
  }
  func.func @transform_3(%arg0: i32, %arg1: i32, %arg2: memref<4xf32, #tpu.memory_space<smem>>) -> (i32, i32) {
    %c1_i32 = arith.constant 1 : i32
    %0 = arith.muli %arg0, %c1_i32 : i32
    %1 = arith.addi %0, %arg1 : i32
    %c0_i32 = arith.constant 0 : i32
    %c0_i32_0 = arith.constant 0 : i32
    return %1, %c0_i32 : i32, i32
  }
  func.func @transform_4(%arg0: i32, %arg1: i32, %arg2: memref<4xf32, #tpu.memory_space<smem>>) -> (i32, i32) {
    %c1_i32 = arith.constant 1 : i32
    %0 = arith.muli %arg0, %c1_i32 : i32
    %1 = arith.addi %0, %arg1 : i32
    %c0_i32 = arith.constant 0 : i32
    %c0_i32_0 = arith.constant 0 : i32
    return %1, %c0_i32 : i32, i32
  }
  func.func @transform_5(%arg0: i32, %arg1: i32, %arg2: memref<4xf32, #tpu.memory_space<smem>>) -> (i32, i32) {
    %c1_i32 = arith.constant 1 : i32
    %0 = arith.muli %arg0, %c1_i32 : i32
    %1 = arith.addi %0, %arg1 : i32
    %c0_i32 = arith.constant 0 : i32
    %c0_i32_0 = arith.constant 0 : i32
    return %1, %c0_i32 : i32, i32
  }
  func.func @transform_6(%arg0: i32, %arg1: i32, %arg2: memref<4xf32, #tpu.memory_space<smem>>) -> (i32, i32, i32) {
    %c0_i32 = arith.constant 0 : i32
    %c0_i32_0 = arith.constant 0 : i32
    %c0_i32_1 = arith.constant 0 : i32
    return %arg0, %c0_i32, %c0_i32_0 : i32, i32, i32
  }
}

</mosaic_0001>

<bundles_post_ra>
// kernel: _criterion_forward.1
= control target key start
LH: loop header
LB: loop body
LE: loop exit
PB: predicated region body
PF: predicated region fallthrough
CT: control target
= control target key end

     0   :  { %s474_s0 = inlined_call_operand.vmem [shape: f32[4], index: 0, kind: input, shape index: {}]   ;;  %s475_s1 = inlined_call_operand.vmem [shape: f32[8,4], index: 1, kind: input, shape index: {}]   ;;  %s476_s2 = inlined_call_operand.vmem [shape: f32[8,8], index: 2, kind: input, shape index: {}]   ;;  %s477_s3 = inlined_call_operand.vmem [shape: f32[8,16], index: 3, kind: input, shape index: {}]   ;;  %s478_s4 = inlined_call_operand.vmem [shape: s32[8,3], index: 4, kind: input, shape index: {}]   ;;  %s479_s5 = inlined_call_operand.vmem [shape: f32[8,2], index: 5, kind: input, shape index: {}]   ;;  %s480_s6 = inlined_call_operand.vmem [shape: f32[8,2], index: 6, kind: input, shape index: {}]   ;;  %s481_s7 = inlined_call_operand.vmem [shape: f32[1,8,128], index: 7, kind: output, shape index: {}]  }
   0x1   :  { %s12_s26 = sshll.u32 %s474_s0, 4  ;;  %s13_s26 = int_to_ptr.vmem [resolvable:$true] %s12_s26 }
   0x2   :  { %s360_s27 = scalar_lea.vmem %s13_s26, 16  ;;  %p365_p1 = scmp.lt.s32.totalorder %s13_s26, %s13_s26 }
   0x3   :  { %p361_p0 = scmp.ne.s32.totalorder %s13_s26, %s360_s27  ;;  %p366_p2 = scmp.lt.s32.totalorder %s360_s27, %s360_s27 }
   0x5   :  { %p367_p3 = por %p366_p2, %p365_p1 }
   0x7   :  { %p368_p4 = pnand %p367_p3, %p361_p0 }
   0x9   :  { %371 = shalt.err (!%p368_p4)  }
   0xa   :  { %s374_s28 = smov [#allocation4]  }
   0xb   :  { %15 = dma.vmem_to_smem %s13_s26, 16, %s374_s28, [#allocation3] }
   0xc   :  { %372 = dma.done.wait [#allocation3], 16 }
   0xd   :  { %373 = vsyncadd [#allocation3], 4294967280 }
   0xe   :  { %17 = sfence }
   0xf   :  { %v144_v0 = vld [vmem:[%s475_s1] sm:$0xff]  ;;  %vm145_vm0 = vcmask 31744   ;;  %vm208_vm1 = vcmask 130048   ;;  %vm178_vm2 = vcmask 64512   ;;  %v375_v6 = vmov 0   ;;  %s337_s13 = sld [smem:[#allocation4 + $0x2]] }
  0x10   :  { %v207_v1 = vld [vmem:[%s477_s3] sm:$0xff]  ;;  %v146_v3 = vsel %vm145_vm0, %v144_v0, -inf  ;;  %344 = vset.pattern.permute.xlu1 %v375_v6  ;;  %v376_v7 = vmov 1   ;;  %v377_v9 = vmov 2   ;;  %v158_v19 = vlaneseq  ;;  %s454_s14 = sld [smem:[#allocation4 + $0x3]] }
  0x11   :  { %v177_v2 = vld [vmem:[%s476_s2] sm:$0xff]  ;;  %v209_v4 = vsel %vm208_vm1, %v207_v1, -inf  ;;  %147 = vmax.xlane.f32.xlu0 %v146_v3  ;;  %vm241_vm6 = vcmask 15360  }
  0x12   :  { %210 = vmax.xlane.f32.xlu1 %v209_v4  ;;  %v179_v5 = vsel %vm178_vm2, %v177_v2, -inf  ;;  %345 = vset.pattern.permute.xlu0 %v376_v7  ;;  %v160_v8 = vld [vmem:[%s478_s4] sm:$0xff]  ;;  %v437_v20 = vand.u32 127, %v158_v19 }
  0x13   :  { %v237_v33 = vld [vmem:[%s479_s5] sm:$0xff]  ;;  %s274_s5 = sld [smem:[#allocation4]] }
  0x14   :  { %v238_v34 = vld [vmem:[%s480_s6] sm:$0xff]  ;;  %s336_s6 = sld [smem:[#allocation4 + $0x1]]  ;;  %vm253_vm7 = vcmp.eq.s32.totalorder %v437_v20, 0  ;;  %vm255_vm8 = vcmp.eq.s32.totalorder %v437_v20, 1  ;;  %vm258_vm9 = vcmp.eq.s32.totalorder %v437_v20, 2  ;;  %vm261_vm10 = vcmp.eq.s32.totalorder %v437_v20, 3 }
  0x15   :  { %180 = vmax.xlane.f32.xlu0 %v179_v5  ;;  %v239_v36 = vsub.f32 %v237_v33, %v238_v34  ;;  %vm269_vm11 = vcmp.lt.s32.totalorder %v437_v20, 3  ;;  %vm292_vm12 = vcmp.eq.s32.totalorder %v437_v20, 4 }
  0x17   :  { %v240_v39 = vand.u32 2147483647, %v239_v36 }
  0x19   :  { %v242_v40 = vsel %vm241_vm6, %v240_v39, 0.0 }
  0x23   :  { %162 = vperm.xlu1 %344, %v160_v8  }
  0x27   :  { %346 = vset.pattern.permute.xlu1 %v377_v9 }
  0x28   :  { %222 = vperm.xlu1 %346, %v160_v8  }
  0x2b   :  { %192 = vperm.xlu0 %345, %v160_v8   ;;  %v275_v8 = vstv %s274_s5 }
  0x2f   :  { %347 = vset.pattern.permute.xlu0 %v377_v9  ;;  %v278_v9 = vstv %s336_s6 }
  0x9e   :  { %v148_v10 = vpop.xlane.xlu0 %147 }
  0x9f   :  { %v211_v11 = vpop.xlane.xlu1 %210  ;;  %v149_v12 = vsub.f32 %v144_v0, %v148_v10 }
  0xa0   :  { %v212_v13 = vsub.f32 %v207_v1, %v211_v11 }
  0xa1   :  { %v150_v14 = vmul.f32 1.442695, %v149_v12 }
  0xa2   :  { %v213_v15 = vmul.f32 1.442695, %v212_v13  ;;  %v181_v16 = vpop.xlane.xlu0 %180 }
  0xa3   :  { %348 = vpow2.f32 %v150_v14  ;;  %v182_v17 = vsub.f32 %v177_v2, %v181_v16  ;;  %v163_v21 = vpop.permute.xlu1 %162 }
  0xa4   :  { %350 = vpow2.f32 %v213_v15  ;;  %vm164_vm3 = vcmp.eq.s32.totalorder %v437_v20, %v163_v21  ;;  %v276_v15 = vsel %vm253_vm7, %v275_v8, 0.0 }
  0xa5   :  { %v183_v18 = vmul.f32 1.442695, %v182_v17  ;;  %v165_v28 = vsel %vm164_vm3, %v144_v0, 0.0 }
  0xa6   :  { %v166_v31 = vsel %vm145_vm0, %v165_v28, 0.0 }
  0xa7   :  { %352 = vpow2.f32 %v183_v18  ;;  %v223_v30 = vpop.permute.xlu1 %222  ;;  %v282_v18 = vstv %s337_s13 }
  0xa8   :  { %vm224_vm5 = vcmp.eq.s32.totalorder %v437_v20, %v223_v30 }
  0xa9   :  { %v225_v37 = vsel %vm224_vm5, %v207_v1, 0.0 }
  0xaa   :  { %v193_v25 = vpop.permute.xlu0 %192  ;;  %v226_v38 = vsel %vm208_vm1, %v225_v37, 0.0 }
  0xab   :  { %vm194_vm4 = vcmp.eq.s32.totalorder %v437_v20, %v193_v25 }
  0xac   :  { %v195_v32 = vsel %vm194_vm4, %v177_v2, 0.0 }
  0xad   :  { %v349_v22 = vpop.eup %348  ;;  %v196_v35 = vsel %vm178_vm2, %v195_v32, 0.0  ;;  %v378_v32 = vmov 0.0  }
  0xae   :  { %v351_v23 = vpop.eup %350  ;;  %v152_v24 = vsel %vm145_vm0, %v349_v22, 0.0  ;;  %v270_v33 = vsel %vm261_vm10, 0.0625, %v378_v32 }
  0xaf   :  { %153 = vadd.xlane.f32.xlu1 %v152_v24  ;;  %v215_v26 = vsel %vm208_vm1, %v351_v23, 0.0  ;;  %v271_v39 = vsel %vm269_vm11, 0.125, %v270_v33 }
  0xb1   :  { %v353_v27 = vpop.eup %352 }
  0xb2   :  { %v185_v29 = vsel %vm178_vm2, %v353_v27, 0.0  ;;  %v286_v27 = vstv %s454_s14 }
  0xb3   :  { %216 = vadd.xlane.f32.xlu1 %v215_v26  ;;  %186 = vadd.xlane.f32.xlu0 %v185_v29  ;;  %v283_v26 = vsel %vm258_vm9, %v282_v18, 0.0  ;;  %v287_v36 = vsel %vm261_vm10, %v286_v27, 0.0 }
  0xb7   :  { %167 = vadd.xlane.f32.xlu1 %v166_v31 }
  0xbb   :  { %197 = vadd.xlane.f32.xlu1 %v196_v35 }
  0xbf   :  { %227 = vadd.xlane.f32.xlu1 %v226_v38 }
  0xc3   :  { %243 = vadd.xlane.f32.xlu1 %v242_v40 }
 0x13c   :  { %v154_v41 = vpop.xlane.xlu1 %153 }
 0x13d   :  { %354 = vlog2.f32 %v154_v41 }
 0x140   :  { %v217_v42 = vpop.xlane.xlu1 %216  ;;  %v187_v43 = vpop.xlane.xlu0 %186 }
 0x141   :  { %356 = vlog2.f32 %v217_v42 }
 0x142   :  { %358 = vlog2.f32 %v187_v43 }
 0x144   :  { %v168_v44 = vpop.xlane.xlu1 %167 }
 0x147   :  { %v355_v45 = vpop.eup %354 }
 0x148   :  { %v156_v46 = vmul.f32 0.6931472, %v355_v45  ;;  %v198_v47 = vpop.xlane.xlu1 %197 }
 0x14a   :  { %v157_v48 = vadd.f32 %v156_v46, %v148_v10 }
 0x14b   :  { %v357_v49 = vpop.eup %356 }
 0x14c   :  { %v359_v50 = vpop.eup %358  ;;  %v219_v51 = vmul.f32 0.6931472, %v357_v49  ;;  %v169_v52 = vsub.f32 %v157_v48, %v168_v44  ;;  %v228_v53 = vpop.xlane.xlu1 %227 }
 0x14d   :  { %v189_v54 = vmul.f32 0.6931472, %v359_v50 }
 0x14e   :  { %v171_v55 = vrot.slane %v169_v52, 4  ;;  %v220_v56 = vadd.f32 %v219_v51, %v211_v11 }
 0x14f   :  { %v190_v57 = vadd.f32 %v189_v54, %v181_v16  ;;  %v279_v16 = vsel %vm255_vm8, %v278_v9, 0.0 }
 0x150   :  { %v172_v58 = vadd.f32 %v171_v55, %v169_v52  ;;  %v229_v59 = vsub.f32 %v220_v56, %v228_v53  ;;  %v244_v60 = vpop.xlane.xlu1 %243  ;;  %v280_v23 = vadd.f32 %v279_v16, %v276_v15 }
 0x151   :  { %v199_v61 = vsub.f32 %v190_v57, %v198_v47  ;;  %v246_v62 = vrot.slane %v244_v60, 4 }
 0x152   :  { %v173_v63 = vrot.slane %v172_v58, 2  ;;  %v231_v0 = vrot.slane %v229_v59, 4  ;;  %v284_v34 = vadd.f32 %v283_v26, %v280_v23 }
 0x153   :  { %v201_v1 = vrot.slane %v199_v61, 4  ;;  %v247_v2 = vadd.f32 %v246_v62, %v244_v60 }
 0x154   :  { %v174_v3 = vadd.f32 %v173_v63, %v172_v58  ;;  %v232_v4 = vadd.f32 %v231_v0, %v229_v59  ;;  %v288_v41 = vadd.f32 %v287_v36, %v284_v34 }
 0x155   :  { %v202_v5 = vadd.f32 %v201_v1, %v199_v61  ;;  %v248_v6 = vrot.slane %v247_v2, 2 }
 0x156   :  { %v233_v7 = vrot.slane %v232_v4, 2  ;;  %v175_v10 = vrot.slane %v174_v3, 1 }
 0x157   :  { %v203_v11 = vrot.slane %v202_v5, 2  ;;  %v249_v12 = vadd.f32 %v248_v6, %v247_v2 }
 0x158   :  { %v234_v13 = vadd.f32 %v233_v7, %v232_v4  ;;  %v176_v19 = vadd.f32 %v175_v10, %v174_v3 }
 0x159   :  { %v204_v14 = vadd.f32 %v203_v11, %v202_v5  ;;  %v250_v22 = vrot.slane %v249_v12, 1 }
 0x15a   :  { %v235_v17 = vrot.slane %v234_v13, 1  ;;  %v254_v28 = vsel %vm253_vm7, %v176_v19, 0.0 }
 0x15b   :  { %v205_v21 = vrot.slane %v204_v14, 1  ;;  %v251_v30 = vadd.f32 %v250_v22, %v249_v12 }
 0x15c   :  { %v236_v25 = vadd.f32 %v235_v17, %v234_v13 }
 0x15d   :  { %v206_v24 = vadd.f32 %v205_v21, %v204_v14  ;;  %v262_v38 = vsel %vm261_vm10, %v251_v30, 0.0 }
 0x15e   :  { %v259_v35 = vsel %vm258_vm9, %v236_v25, 0.0 }
 0x15f   :  { %v256_v29 = vsel %vm255_vm8, %v206_v24, 0.0 }
 0x160   :  { %v257_v31 = vadd.f32 %v256_v29, %v254_v28 }
 0x162   :  { %v260_v37 = vadd.f32 %v259_v35, %v257_v31 }
 0x164   :  { %v263_v40 = vadd.f32 %v262_v38, %v260_v37 }
 0x166   :  { %v273_v42 = vmul.f32 %v271_v39, %v263_v40 }
 0x168   :  { %v289_v43 = vmul.f32 %v288_v41, %v273_v42 }
 0x16a   :  { %290 = vadd.xlane.f32.xlu1 %v289_v43 }
 0x1f7   :  { %v291_v44 = vpop.xlane.xlu1 %290 }
 0x1f8   :  { %v293_v45 = vsel %vm292_vm12, %v291_v44, 0.0 }
 0x1f9   :  { %v294_v46 = vadd.f32 %v293_v45, %v273_v42 }
 0x1fb   :  { %295 = vst [vmem:[%s481_s7] sm:$0xff] %v294_v46 }

</bundles_post_ra>
